<compile_context>
chip_gen: v7x
topology: tpu7x:2x2x1
jax: 0.10.0
libtpu: 0.0.40
codegen_flags: <defaults>
</compile_context>

<pallas_src>
import functools

import jax
import jax.numpy as jnp
from jax.experimental import pallas as pl
from jax.experimental.pallas import tpu as pltpu


_LANES = 128
_BLOCK_BUDGET_BYTES = 12 * 1024 * 1024   # one set of blocks; x2 for double buffering
_MAX_GROUPS_PER_BLOCK = 64               # bounds the static unroll inside the kernel


def _largest_divisor_leq(total, cap, unit):
    """Largest d <= cap with total % d == 0 and d % unit == 0; falls back to total."""
    if total <= cap:
        return total
    d = (cap // unit) * unit
    while d >= unit:
        if total % d == 0:
            return d
        d -= unit
    return total


def _choose_group_tile(n_groups, gk, max_gb):
    """Groups per block: must divide n_groups and keep the flat last dim 128-aligned."""
    if n_groups <= max_gb:
        return n_groups
    for gb in range(max_gb, 0, -1):
        if n_groups % gb == 0 and (gb * gk) % _LANES == 0:
            return gb
    return n_groups


def _group_action_kernel(a_ref, y_ref, o_ref, *, gb, gk):
    # a_ref: (Gb, GK, GK)  pre-transposed (block-diagonal) action matrices
    # y_ref: (Bb, Gb*GK)   lane-dense slab of patches (native memory order)
    # o_ref: (Bb, Gb*GK)
    for g in range(gb):                       # static unroll, static slices
        sl = pl.ds(g * gk, gk)
        o_ref[:, sl] = jnp.dot(
            y_ref[:, sl], a_ref[g],
            preferred_element_type=jnp.float32,   # f32 accumulation; cast is a no-op for f32 I/O
        ).astype(o_ref.dtype)


def learn_group_action_patch(A, y):
    """A: (1, C, K, K), y: (B, C, k, k) with K == k*k. Returns (B, C, k, k)."""
    B, C, k1, k2 = y.shape
    K = k1 * k2
    assert A.shape == (1, C, K, K)

    # Channels packed per 128-lane group.  Large batch -> pack (full MXU width,
    # unmasked 128-lane stores; A traffic grows G x but y/out dominate).  Small
    # batch -> A traffic dominates, keep it at 1x.
    G = min(max(1, _LANES // K), C) if B >= 32 else 1
    GK = G * K
    C_pad = ((C + G - 1) // G) * G
    n_groups = C_pad // G

    # ---- parameter-side preprocessing of A (amortized across forward calls) ----
    A_t = jnp.swapaxes(A[0], -1, -2)                  # (C, K, K); A_t[c] = A[0, c].T
    if C_pad != C:
        A_t = jnp.pad(A_t, ((0, C_pad - C), (0, 0), (0, 0)))
    if G > 1:
        # Block-diagonal per group: M[n, g*K + j, h*K + i] = A_t[n*G + g, j, i] * delta(g, h)
        A_tg = A_t.reshape(n_groups, G, K, K)
        eye = jnp.eye(G, dtype=A_t.dtype)
        A_op = (A_tg[:, :, :, None, :] * eye[None, :, None, :, None]
                ).reshape(n_groups, GK, GK)
    else:
        A_op = A_t                                    # (n_groups, K, K)

    # ---- y: free (contiguous) reshapes only; activations are never transposed ---
    y3 = y.reshape(B, C, K)
    if C_pad != C:
        y3 = jnp.pad(y3, ((0, 0), (0, C_pad - C), (0, 0)))
    y2 = y3.reshape(B, C_pad * K)                     # lane-dense 2-D slab

    # ---- VMEM-aware tile sizes ---------------------------------------------------
    esz = jnp.dtype(y.dtype).itemsize
    a_esz = jnp.dtype(A.dtype).itemsize
    max_gb = max(1, min(_MAX_GROUPS_PER_BLOCK,
                        (_BLOCK_BUDGET_BYTES // 2) // max(1, GK * GK * a_esz)))
    Gb = _choose_group_tile(n_groups, GK, max_gb)

    a_block = Gb * GK * GK * a_esz
    per_b = 2 * Gb * GK * esz                         # y block + out block, per batch row
    max_bb = max(1, (_BLOCK_BUDGET_BYTES - a_block) // per_b)
    Bb = _largest_divisor_leq(B, max_bb, unit=8)

    # Give single-block problems at least 2 grid steps so a v7x chip can shard the
    # (parallel) grid across its two TensorCores.
    if ((n_groups // Gb) * (B // Bb) < 2 and Gb % 2 == 0
            and ((Gb // 2) * GK) % _LANES == 0):
        Gb //= 2

    grid = (n_groups // Gb, B // Bb)

    out2 = pl.pallas_call(
        functools.partial(_group_action_kernel, gb=Gb, gk=GK),
        out_shape=jax.ShapeDtypeStruct((B, C_pad * K), y.dtype),
        grid_spec=pltpu.PrefetchScalarGridSpec(
            num_scalar_prefetch=0,
            grid=grid,
            in_specs=[
                # A block depends only on the outer (group) axis -> it stays resident
                # (not re-fetched) while the inner batch-tile axis sweeps.
                pl.BlockSpec((Gb, GK, GK), lambda gt, bt: (gt, 0, 0)),
                pl.BlockSpec((Bb, Gb * GK), lambda gt, bt: (bt, gt)),
            ],
            out_specs=pl.BlockSpec((Bb, Gb * GK), lambda gt, bt: (bt, gt)),
        ),
        compiler_params=pltpu.CompilerParams(
            dimension_semantics=("parallel", "parallel"),
            vmem_limit_bytes=48 * 1024 * 1024,
        ),
    )(A_op, y2)

    out3 = out2.reshape(B, C_pad, K)
    if C_pad != C:
        out3 = out3[:, :C, :]
    return out3.reshape(B, C, k1, k2)


def init_A(key, n_channels, kernel_size, dtype=jnp.float32):
    K = kernel_size * kernel_size
    A = jax.random.normal(key, (1, n_channels, K, K), dtype=dtype)
    # F.normalize(p='fro', dim=(-1, -2)) as in the module's __init__.
    norm = jnp.sqrt(jnp.sum(A * A, axis=(-1, -2), keepdims=True))
    return A / jnp.maximum(norm, 1e-12)


def _reference(A, y):
    B, C = y.shape[0], y.shape[1]
    return jnp.einsum('cij,bcj->bci', A[0], y.reshape(B, C, -1),
                      precision=jax.lax.Precision.HIGHEST).reshape(y.shape)


if __name__ == "__main__":
    key = jax.random.PRNGKey(0)

    # (batch, n_channels, kernel_size): primary small case plus cases exercising
    # the lane-packed (block-diagonal) path, multi-step grids and channel padding.
    cases = [
        (2, 4, 4),     # primary demo: G=1 path, single block
        (8, 80, 4),    # G=1 path, multiple channel-group grid steps
        (32, 16, 4),   # lane-packed G=8 block-diagonal path
        (32, 20, 4),   # lane-packed path with channel padding (20 -> 24)
    ]
    for batch, n_channels, kernel_size in cases:
        key, k_a, k_y = jax.random.split(key, 3)
        A = init_A(k_a, n_channels, kernel_size)
        y = jax.random.normal(
            k_y, (batch, n_channels, kernel_size, kernel_size), dtype=jnp.float32)

        out = jax.block_until_ready(learn_group_action_patch(A, y))
        ref = _reference(A, y)
        assert out.shape == y.shape, (batch, n_channels, kernel_size)
        assert jnp.allclose(out, ref, atol=1e-5, rtol=1e-5), (batch, n_channels, kernel_size)

    print("KERNEL_OK")
</pallas_src>

<mosaic_0001>
module attributes {stable_mosaic.version = 11 : i64} {
  func.func @_group_action_kernel(%arg0: i32, %arg1: i32, %arg2: memref<4x16x16xf32, #tpu.memory_space<vmem>>, %arg3: memref<2x64xf32, #tpu.memory_space<vmem>>, %arg4: memref<2x64xf32, #tpu.memory_space<vmem>>) attributes {dimension_semantics = [#tpu.dimension_semantics<parallel>, #tpu.dimension_semantics<parallel>], iteration_bounds = array<i64: 1, 1>, scalar_prefetch = 0 : i64, scratch_operands = 0 : i64, tpu.core_type = #tpu.core_type<tc>, window_params = [{transform_indices = @transform_0, window_bounds = array<i64: 4, 16, 16>}, {transform_indices = @transform_1, window_bounds = array<i64: 2, 64>}, {transform_indices = @transform_2, window_bounds = array<i64: 2, 64>}]} {
    %c0 = arith.constant 0 : index
    %c0_0 = arith.constant 0 : index
    %0 = vector.load %arg3[%c0, %c0_0] : memref<2x64xf32, #tpu.memory_space<vmem>>, vector<2x16xf32>
    %c0_1 = arith.constant 0 : index
    %c0_2 = arith.constant 0 : index
    %c0_3 = arith.constant 0 : index
    %1 = vector.load %arg2[%c0_1, %c0_2, %c0_3] : memref<4x16x16xf32, #tpu.memory_space<vmem>>, vector<1x16x16xf32>
    %2 = vector.shape_cast %1 : vector<1x16x16xf32> to vector<16x16xf32>
    %cst = arith.constant dense<0.000000e+00> : vector<2x16xf32>
    %3 = tpu.matmul %0, %2, %cst {dimension_numbers = #tpu.dot_dimension_numbers<[1], [0], [0], [1], [0, 0, 1, 1], [], []>} : vector<2x16xf32>, vector<16x16xf32>, vector<2x16xf32> -> vector<2x16xf32>
    %c0_4 = arith.constant 0 : index
    %c0_5 = arith.constant 0 : index
    %4 = vector.load %arg4[%c0_4, %c0_5] : memref<2x64xf32, #tpu.memory_space<vmem>>, vector<2x16xf32>
    tpu.vector_store %arg4[%c0_4, %c0_5], %3 {strides = array<i32>} : memref<2x64xf32, #tpu.memory_space<vmem>>, vector<2x16xf32>,
    %c0_6 = arith.constant 0 : index
    %c16 = arith.constant 16 : index
    %5 = vector.load %arg3[%c0_6, %c16] : memref<2x64xf32, #tpu.memory_space<vmem>>, vector<2x16xf32>
    %c1 = arith.constant 1 : index
    %c0_7 = arith.constant 0 : index
    %c0_8 = arith.constant 0 : index
    %6 = vector.load %arg2[%c1, %c0_7, %c0_8] : memref<4x16x16xf32, #tpu.memory_space<vmem>>, vector<1x16x16xf32>
    %7 = vector.shape_cast %6 : vector<1x16x16xf32> to vector<16x16xf32>
    %cst_9 = arith.constant dense<0.000000e+00> : vector<2x16xf32>
    %8 = tpu.matmul %5, %7, %cst_9 {dimension_numbers = #tpu.dot_dimension_numbers<[1], [0], [0], [1], [0, 0, 1, 1], [], []>} : vector<2x16xf32>, vector<16x16xf32>, vector<2x16xf32> -> vector<2x16xf32>
    %c0_10 = arith.constant 0 : index
    %c16_11 = arith.constant 16 : index
    %9 = vector.load %arg4[%c0_10, %c16_11] : memref<2x64xf32, #tpu.memory_space<vmem>>, vector<2x16xf32>
    tpu.vector_store %arg4[%c0_10, %c16_11], %8 {strides = array<i32>} : memref<2x64xf32, #tpu.memory_space<vmem>>, vector<2x16xf32>,
    %c0_12 = arith.constant 0 : index
    %c32 = arith.constant 32 : index
    %10 = vector.load %arg3[%c0_12, %c32] : memref<2x64xf32, #tpu.memory_space<vmem>>, vector<2x16xf32>
    %c2 = arith.constant 2 : index
    %c0_13 = arith.constant 0 : index
    %c0_14 = arith.constant 0 : index
    %11 = vector.load %arg2[%c2, %c0_13, %c0_14] : memref<4x16x16xf32, #tpu.memory_space<vmem>>, vector<1x16x16xf32>
    %12 = vector.shape_cast %11 : vector<1x16x16xf32> to vector<16x16xf32>
    %cst_15 = arith.constant dense<0.000000e+00> : vector<2x16xf32>
    %13 = tpu.matmul %10, %12, %cst_15 {dimension_numbers = #tpu.dot_dimension_numbers<[1], [0], [0], [1], [0, 0, 1, 1], [], []>} : vector<2x16xf32>, vector<16x16xf32>, vector<2x16xf32> -> vector<2x16xf32>
    %c0_16 = arith.constant 0 : index
    %c32_17 = arith.constant 32 : index
    %14 = vector.load %arg4[%c0_16, %c32_17] : memref<2x64xf32, #tpu.memory_space<vmem>>, vector<2x16xf32>
    tpu.vector_store %arg4[%c0_16, %c32_17], %13 {strides = array<i32>} : memref<2x64xf32, #tpu.memory_space<vmem>>, vector<2x16xf32>,
    %c0_18 = arith.constant 0 : index
    %c48 = arith.constant 48 : index
    %15 = vector.load %arg3[%c0_18, %c48] : memref<2x64xf32, #tpu.memory_space<vmem>>, vector<2x16xf32>
    %c3 = arith.constant 3 : index
    %c0_19 = arith.constant 0 : index
    %c0_20 = arith.constant 0 : index
    %16 = vector.load %arg2[%c3, %c0_19, %c0_20] : memref<4x16x16xf32, #tpu.memory_space<vmem>>, vector<1x16x16xf32>
    %17 = vector.shape_cast %16 : vector<1x16x16xf32> to vector<16x16xf32>
    %cst_21 = arith.constant dense<0.000000e+00> : vector<2x16xf32>
    %18 = tpu.matmul %15, %17, %cst_21 {dimension_numbers = #tpu.dot_dimension_numbers<[1], [0], [0], [1], [0, 0, 1, 1], [], []>} : vector<2x16xf32>, vector<16x16xf32>, vector<2x16xf32> -> vector<2x16xf32>
    %c0_22 = arith.constant 0 : index
    %c48_23 = arith.constant 48 : index
    %19 = vector.load %arg4[%c0_22, %c48_23] : memref<2x64xf32, #tpu.memory_space<vmem>>, vector<2x16xf32>
    tpu.vector_store %arg4[%c0_22, %c48_23], %18 {strides = array<i32>} : memref<2x64xf32, #tpu.memory_space<vmem>>, vector<2x16xf32>,
    return
  }
  func.func @transform_0(%arg0: i32, %arg1: i32) -> (i32, i32, i32) {
    %c0_i32 = arith.constant 0 : i32
    %c0_i32_0 = arith.constant 0 : i32
    %c0_i32_1 = arith.constant 0 : i32
    return %arg0, %c0_i32, %c0_i32_0 : i32, i32, i32
  }
  func.func @transform_1(%arg0: i32, %arg1: i32) -> (i32, i32) {
    %c0_i32 = arith.constant 0 : i32
    return %arg1, %arg0 : i32, i32
  }
  func.func @transform_2(%arg0: i32, %arg1: i32) -> (i32, i32) {
    %c0_i32 = arith.constant 0 : i32
    return %arg1, %arg0 : i32, i32
  }
}

</mosaic_0001>

<bundles_post_ra>
// kernel: tpu_custom_call.1
= control target key start
LH: loop header
LB: loop body
LE: loop exit
PB: predicated region body
PF: predicated region fallthrough
CT: control target
= control target key end

     0   :  { %7 = vsyncpa [#allocation3], 0  ;;  %s564_s0 = inlined_call_operand.hbm [shape: f32[4,16,16], index: 0, kind: input, shape index: {}]   ;;  %s565_s1 = inlined_call_operand.vmem [shape: f32[2,64], index: 1, kind: input, shape index: {}]   ;;  %s566_s2 = inlined_call_operand.hbm [shape: f32[2,64], index: 2, kind: output, shape index: {}]  }
   0x1   :  { %8 = vsyncpa [#allocation4], 0  ;;  %s492_s9 = smov [#allocation2]   ;;  %s444_s13 = scalar_lea.hbm %s564_s0, 1024 }
   0x2   :  { %s14_s10 = sshll.u32 %s492_s9, 4  ;;  %p445_p0 = scmp.ne.s32.totalorder %s564_s0, %s444_s13  ;;  %s15_s10 = int_to_ptr.vmem [resolvable:$true] %s14_s10 }
   0x3   :  { %p448_p1 = scmp.lt.u32.totalorder %s444_s13, %s564_s0 }
   0x5   :  { %p450_p2 = pnand %p448_p1, %p445_p0 }
   0x7   :  { %453 = shalt.err (!%p450_p2)
}
   0x8   :  { %s454_s18 = scalar_lea.vmem %s15_s10, 1024  ;;  %p459_p4 = scmp.lt.s32.totalorder %s15_s10, %s15_s10 }
   0x9   :  { %p455_p3 = scmp.ne.s32.totalorder %s15_s10, %s454_s18  ;;  %p460_p5 = scmp.lt.s32.totalorder %s454_s18, %s454_s18 }
   0xb   :  { %p461_p6 = por %p460_p5, %p459_p4 }
   0xd   :  { %p462_p7 = pnand %p461_p6, %p455_p3 }
   0xf   :  { %465 = shalt.err (!%p462_p7)
}
  0x10   :  { %s493_s19 = smov 128   ;;  %s494_s20 = smov 8  }
  0x11   :  { %20 = dma.hbm_to_vmem [thread:$0]  %s564_s0, 1024, %s15_s10, [#allocation3], %s493_s19, %s493_s19, %s494_s20  }
  0x12   :  { %488 = dma.done.wait [#allocation3], 1024  }
  0x13   :  { %489 = vsyncadd [#allocation3], 4294966272  ;;  %v495_v0 = vmov 0.0|0.0   ;;  %vm496_vm0 = vmmov 0   ;;  %v497_v1 = vmov 0.0   ;;  %s498_s0 = smov 112  }
  0x14   :  { %419 = vmatprep.subr.bf16.mxu0 %v495_v0  ;;  %422 = vmatprep.subr.bf16.mxu1 %v495_v0  ;;  %v105_v2 = vld [vmem:[%s565_s1] sm:$0x3]  ;;  %s499_s27 = smov 80   ;;  %v28_v5 = vld [vmem:[#allocation2 + $0x8] sm:$0xff]  ;;  %v107_v6 = vld [vmem:[#allocation2 + $0x10] sm:$0xff]  ;;  %vm29_vm1 = vcmask 130048  }
  0x15   :  { %395 = vmatprep.mubr.msk.f32.mxu0 %vm496_vm0, %v497_v1  ;;  %402 = vmatprep.mubr.msk.f32.mxu1 %vm496_vm0, %v497_v1  ;;  %v275_v3 = vld [vmem:[%s565_s1] sm:$0x3]  ;;  %v108_v9 = vld [vmem:[#allocation2 + $0x18] sm:$0xff]  ;;  %v193_v12 = vld [vmem:[#allocation2 + $0x28] sm:$0xff]  ;;  %s500_s4 = smov 96   ;;  %vm103_vm2 = vcmask 123904  }
  0x16   :  { %110 = vrot.lane.b32.xlu0 %v105_v2, %s498_s0  ;;  %280 = vrot.lane.b32.xlu1 %v275_v3, %s499_s27  ;;  %v27_v4 = vld [vmem:[#allocation2] sm:$0xff]  ;;  %v423_v11 = vpack.c.bf16 %v108_v9, %v107_v6  ;;  %v277_v15 = vld [vmem:[#allocation2 + $0x30] sm:$0xff]  ;;  %v278_v16 = vld [vmem:[#allocation2 + $0x38] sm:$0xff]  ;;  %s502_s5 = smov 32   ;;  %s503_s6 = smov 48   ;;  %vm188_vm3 = vcmask 255104  }
  0x17   :  { %v190_v7 = vld [vmem:[%s565_s1] sm:$0x3]  ;;  %v420_v8 = vpack.c.bf16 %v28_v5, %v27_v4  ;;  %v429_v17 = vpack.c.bf16 %v278_v16, %v277_v15  ;;  %s504_s7 = smov [#allocation5]   ;;  %vm273_vm4 = vcmask 386304   ;;  %vm358_vm5 = vcmask 517504  }
  0x18   :  { %v192_v10 = vld [vmem:[#allocation2 + $0x20] sm:$0xff]  ;;  %424 = vmatpush3.bf16.msra.mxu1 %v423_v11  ;;  %s366_s8 = sshll.u32 %s504_s7, 4  ;;  %s367_s8 = int_to_ptr.vmem [resolvable:$true] %s366_s8 }
  0x19   :  { %421 = vmatpush3.bf16.msra.mxu0 %v420_v8  ;;  %v26_v13 = vld [vmem:[%s565_s1] sm:$0x3]  ;;  %v426_v14 = vpack.c.bf16 %v193_v12, %v192_v10  ;;  %428 = vmatprep.subr.bf16.mxu1 %v495_v0  ;;  %s501_s1 = smov 16   ;;  %s466_s9 = scalar_lea.vmem %s367_s8, 32 }
  0x1a   :  { %195 = vrot.lane.b32.xlu0 %v190_v7, %s500_s4  ;;  %425 = vmatprep.subr.bf16.mxu0 %v495_v0  ;;  %p467_p8 = scmp.ne.s32.totalorder %s367_s8, %s466_s9  ;;  %p471_p9 = scmp.lt.s32.totalorder %s367_s8, %s367_s8 }
  0x1b   :  { %p472_p10 = scmp.lt.s32.totalorder %s466_s9, %s466_s9 }
  0x1c   :  { %396 = vmatmul.mubr.msk.f32.vlgmr.msra.gmra.mrb[0].mxu0 %vm29_vm1, %v26_v13 }
  0x1d   :  { %427 = vmatpush3.bf16.msra.mxu0 %v426_v14  ;;  %409 = vmatprep.mubr.msk.f32.mxu0 %vm496_vm0, %v497_v1  ;;  %p473_p11 = por %p472_p10, %p471_p9 }
  0x1f   :  { %p474_p12 = pnand %p473_p11, %p467_p8 }
  0x88   :  { %v111_v18 = vpop.permute.xlu0 %110  ;;  %v281_v19 = vpop.permute.xlu1 %280 }
  0x89   :  { %403 = vmatmul.mubr.msk.f32.vlgmr.msra.gmra.mrb[0].mxu1 %vm29_vm1, %v111_v18 }
  0x8a   :  { %430 = vmatpush3.bf16.msra.mxu1 %v429_v17  ;;  %416 = vmatprep.mubr.msk.f32.mxu1 %vm496_vm0, %v497_v1 }
  0x8c   :  { %v196_v20 = vpop.permute.xlu0 %195 }
  0x8d   :  { %410 = vmatmul.mubr.msk.f32.vlgmr.msra.gmra.mrb[2].mxu0 %vm29_vm1, %v196_v20  ;;  %417 = vmatmul.mubr.msk.f32.vlgmr.msra.gmra.mrb[2].mxu1 %vm29_vm1, %v281_v19 }
  0xef   :  { %v99_v21 = vpop.f32.mrb[0].mxu0 }
  0xf0   :  { %104 = vst.msk [vmem:[#allocation5] sm:$0x3] %vm103_vm2, %v99_v21  ;;  %v397_v22 = vpop.f32.mrb[1].mxu0 }
 0x15c   :  { %v180_v23 = vpop.f32.mrb[0].mxu1 }
 0x15d   :  { %185 = vrot.lane.b32.xlu1 %v180_v23, %s501_s1  ;;  %v404_v24 = vpop.f32.mrb[1].mxu1 }
 0x160   :  { %v265_v25 = vpop.f32.mrb[2].mxu0  ;;  %v350_v26 = vpop.f32.mrb[2].mxu1 }
 0x161   :  { %v418_v27 = vpop.f32.mrb[3].mxu1  ;;  %270 = vrot.lane.b32.xlu0 %v265_v25, %s502_s5  ;;  %v411_v28 = vpop.f32.mrb[3].mxu0  ;;  %355 = vrot.lane.b32.xlu1 %v350_v26, %s503_s6 }
 0x1cf   :  { %v186_v29 = vpop.permute.xlu1 %185 }
 0x1d0   :  { %189 = vst.msk [vmem:[#allocation5] sm:$0x3] %vm188_vm3, %v186_v29 }
 0x1d3   :  { %v271_v30 = vpop.permute.xlu0 %270  ;;  %v356_v31 = vpop.permute.xlu1 %355 }
 0x1d4   :  { %274 = vst.msk [vmem:[#allocation5] sm:$0x3] %vm273_vm4, %v271_v30 }
 0x1d5   :  { %359 = vst.msk [vmem:[#allocation5] sm:$0x3] %vm358_vm5, %v356_v31 }
 0x1d6   :  { %477 = shalt.err (!%p474_p12)
}
 0x1d7   :  { %s478_s12 = scalar_lea.hbm %s566_s2, 32 }
 0x1d8   :  { %p479_p13 = scmp.ne.s32.totalorder %s566_s2, %s478_s12  ;;  %p482_p0 = scmp.lt.u32.totalorder %s478_s12, %s566_s2 }
 0x1da   :  { %p484_p1 = pnand %p482_p0, %p479_p13 }
 0x1dc   :  { %487 = shalt.err (!%p484_p1)
}
 0x1dd   :  { %369 = dma.vmem_to_hbm [thread:$0]  %s367_s8, 32, %s566_s2, [#allocation4]  }
 0x1de   :  { %490 = dma.done.wait [#allocation4], 32  }
 0x1df   :  { %491 = vsyncadd [#allocation4], 4294967264 }
 0x1e0   :  { %373 = vsyncpa [#allocation3], 1 }
 0x1e1   :  { %374 = vsyncpa [#allocation4], 1 }

</bundles_post_ra>
